<compile_context>
chip_gen: v6e
topology: v6e:2x2x1
jax: 0.10.0
libtpu: 0.0.40
codegen_flags: <defaults>
</compile_context>

<pallas_src>
import functools

import jax
import jax.numpy as jnp
from jax.experimental import pallas as pl
from jax.experimental.pallas import tpu as pltpu


def _gather_dma_kernel(ids_ref, table_hbm, out_ref, sems, *, rows_per_step):
    """Manual K-way DMA row gather (table stays in HBM).

    ids_ref   : SMEM (3*B_pad,) int32  -- scalar-prefetch gather indices.
    table_hbm : ANY/HBM (N, D)         -- embedding table, never loaded whole.
    out_ref   : VMEM (K, D)            -- output block for this grid step.
    sems      : DMA semaphores, one per in-flight row copy.
    """
    K = rows_per_step
    base = pl.program_id(0) * K

    # Read all scalar ids up front (cheap SMEM reads, kept ahead of any wait).
    row_ids = [ids_ref[base + r] for r in range(K)]

    # Start all K row DMAs before waiting on any -> K copies in flight,
    # writing directly into the pipelined output block (no extra VMEM copy).
    copies = []
    for r in range(K):
        cp = pltpu.make_async_copy(
            table_hbm.at[pl.ds(row_ids[r], 1), :],   # (1, D) HBM row
            out_ref.at[pl.ds(r, 1), :],              # (1, D) output slot
            sems.at[r],
        )
        cp.start()
        copies.append(cp)
    for cp in copies:
        cp.wait()


def _gather_resident_kernel(ids_ref, table_ref, out_ref, *, rows_per_step):
    """Small-table fast path: whole table resident in VMEM, gather in-VMEM.

    ids_ref   : SMEM (3*B_pad,) int32
    table_ref : VMEM (N, D) full table (constant block index -> loaded once)
    out_ref   : VMEM (K, D)
    """
    K = rows_per_step
    base = pl.program_id(0) * K
    for r in range(K):
        idx = ids_ref[base + r]
        out_ref[pl.ds(r, 1), :] = table_ref[pl.ds(idx, 1), :]


def mf_forward(embeds, users, pos_items, neg_items, *,
               rows_per_step=32, resident_table_max_bytes=16 << 20):
    """Pallas equivalent of MF.forward(batch).

    Returns (user_embs, pos_item_embs, neg_item_embs,
             user_embs, pos_item_embs, neg_item_embs), matching PyTorch.
    """
    B = users.shape[0]
    assert B > 0, "empty batch"
    N, D = embeds.shape

    # Rows per grid step; keep it sublane-friendly (multiple of 8).
    K = max(8, ((int(rows_per_step) + 7) // 8) * 8)
    B_pad = ((B + K - 1) // K) * K

    def prep(ix):
        ix = jnp.clip(ix.astype(jnp.int32), 0, N - 1)      # OOB-safe gather ids
        if B_pad != B:
            ix = jnp.concatenate([ix, jnp.zeros((B_pad - B,), jnp.int32)])
        return ix

    ids = jnp.concatenate([prep(users), prep(pos_items), prep(neg_items)])  # (3*B_pad,)
    total = 3 * B_pad
    grid = (total // K,)

    out_shape = jax.ShapeDtypeStruct((total, D), embeds.dtype)
    out_spec = pl.BlockSpec((K, D), lambda i, ids_ref: (i, 0))

    table_bytes = N * D * jnp.dtype(embeds.dtype).itemsize

    if table_bytes <= resident_table_max_bytes:
        # Small-table fast path: table resident in VMEM, in-VMEM row gather.
        out = pl.pallas_call(
            functools.partial(_gather_resident_kernel, rows_per_step=K),
            out_shape=out_shape,
            grid_spec=pltpu.PrefetchScalarGridSpec(
                num_scalar_prefetch=1,
                grid=grid,
                in_specs=[pl.BlockSpec((N, D), lambda i, ids_ref: (0, 0))],
                out_specs=out_spec,
            ),
            compiler_params=pltpu.CompilerParams(
                dimension_semantics=("parallel",),
                vmem_limit_bytes=48 << 20,   # safe on v7x (64 MiB physical) too
            ),
        )(ids, embeds)
    else:
        # Large-table path: manual K-way DMA row gather, table stays in HBM.
        out = pl.pallas_call(
            functools.partial(_gather_dma_kernel, rows_per_step=K),
            out_shape=out_shape,
            grid_spec=pltpu.PrefetchScalarGridSpec(
                num_scalar_prefetch=1,
                grid=grid,
                in_specs=[pl.BlockSpec(memory_space=pl.ANY)],
                out_specs=out_spec,
                scratch_shapes=[pltpu.SemaphoreType.DMA((K,))],
            ),
            compiler_params=pltpu.CompilerParams(
                dimension_semantics=("parallel",),
            ),
        )(ids, embeds)

    out3 = out.reshape(3, B_pad, D)
    user_e = out3[0, :B]
    pos_e = out3[1, :B]
    neg_e = out3[2, :B]
    # The module returns each tensor twice (aliased, no extra compute).
    return user_e, pos_e, neg_e, user_e, pos_e, neg_e


def xavier_uniform(key, shape, dtype=jnp.float32):
    fan_in, fan_out = shape[0], shape[1]
    bound = (6.0 / (fan_in + fan_out)) ** 0.5
    return jax.random.uniform(key, shape, dtype=dtype, minval=-bound, maxval=bound)


if __name__ == "__main__":
    # Small synthetic config (mirrors args.n_users / args.n_items / args.embedding_dim).
    n_users, n_items, embedding_dim = 10, 12, 32
    batch = 8

    key = jax.random.PRNGKey(0)
    k_emb, k_u, k_p, k_n = jax.random.split(key, 4)

    # nn.Parameter(xavier_uniform(empty(n_users + n_items, embedding_dim)))
    embeds = xavier_uniform(k_emb, (n_users + n_items, embedding_dim))

    users = jax.random.randint(k_u, (batch,), 0, n_users, dtype=jnp.int32)
    pos_items = jax.random.randint(k_p, (batch,), n_users, n_users + n_items, dtype=jnp.int32)
    neg_items = jax.random.randint(k_n, (batch,), n_users, n_users + n_items, dtype=jnp.int32)

    # Reference: plain JAX gathers (same semantics as torch indexing).
    ref_u = embeds[users]
    ref_p = embeds[pos_items]
    ref_n = embeds[neg_items]
    refs = (ref_u, ref_p, ref_n, ref_u, ref_p, ref_n)

    # 1) Small-table fast path (VMEM-resident gather) -- default for this config.
    outs = jax.block_until_ready(mf_forward(embeds, users, pos_items, neg_items))
    for got, want in zip(outs, refs):
        assert got.shape == want.shape and got.dtype == want.dtype
        assert jnp.array_equal(got, want), "resident-path mismatch vs reference"

    # 2) Large-table path (manual K-way DMA gather), forced by zero threshold.
    outs_dma = jax.block_until_ready(
        mf_forward(embeds, users, pos_items, neg_items, resident_table_max_bytes=0))
    for got, want in zip(outs_dma, refs):
        assert got.shape == want.shape and got.dtype == want.dtype
        assert jnp.array_equal(got, want), "DMA-path mismatch vs reference"

    print("KERNEL_OK")
</pallas_src>

<mosaic_0001>
module attributes {stable_mosaic.version = 11 : i64} {
  func.func @_gather_resident_kernel(%arg0: i32, %arg1: memref<96xi32, #tpu.memory_space<smem>>, %arg2: memref<22x32xf32, #tpu.memory_space<vmem>>, %arg3: memref<32x32xf32, #tpu.memory_space<vmem>>) attributes {dimension_semantics = [#tpu.dimension_semantics<parallel>], iteration_bounds = array<i64: 3>, scalar_prefetch = 1 : i64, scratch_operands = 0 : i64, tpu.core_type = #tpu.core_type<tc>, window_params = [{pipeline_mode = #tpu.pipeline_mode<synchronous>, transform_indices = @transform_0, window_bounds = array<i64: 22, 32>}, {transform_indices = @transform_1, window_bounds = array<i64: 32, 32>}]} {
    %c32_i32 = arith.constant 32 : i32
    %0 = arith.muli %arg0, %c32_i32 : i32
    %c0_i32 = arith.constant 0 : i32
    %1 = arith.addi %0, %c0_i32 : i32
    %2 = arith.index_cast %1 : i32 to index
    %3 = memref.load %arg1[%2] : memref<96xi32, #tpu.memory_space<smem>>
    %4 = arith.index_cast %3 : i32 to index
    %c0 = arith.constant 0 : index
    %5 = vector.load %arg2[%4, %c0] : memref<22x32xf32, #tpu.memory_space<vmem>>, vector<1x32xf32>
    %c0_0 = arith.constant 0 : index
    %c0_1 = arith.constant 0 : index
    %6 = vector.load %arg3[%c0_0, %c0_1] : memref<32x32xf32, #tpu.memory_space<vmem>>, vector<1x32xf32>
    tpu.vector_store %arg3[%c0_0, %c0_1], %5 {strides = array<i32>} : memref<32x32xf32, #tpu.memory_space<vmem>>, vector<1x32xf32>,
    %c1_i32 = arith.constant 1 : i32
    %7 = arith.addi %0, %c1_i32 : i32
    %8 = arith.index_cast %7 : i32 to index
    %9 = memref.load %arg1[%8] : memref<96xi32, #tpu.memory_space<smem>>
    %10 = arith.index_cast %9 : i32 to index
    %c0_2 = arith.constant 0 : index
    %11 = vector.load %arg2[%10, %c0_2] : memref<22x32xf32, #tpu.memory_space<vmem>>, vector<1x32xf32>
    %c1 = arith.constant 1 : index
    %c0_3 = arith.constant 0 : index
    %12 = vector.load %arg3[%c1, %c0_3] : memref<32x32xf32, #tpu.memory_space<vmem>>, vector<1x32xf32>
    tpu.vector_store %arg3[%c1, %c0_3], %11 {strides = array<i32>} : memref<32x32xf32, #tpu.memory_space<vmem>>, vector<1x32xf32>,
    %c2_i32 = arith.constant 2 : i32
    %13 = arith.addi %0, %c2_i32 : i32
    %14 = arith.index_cast %13 : i32 to index
    %15 = memref.load %arg1[%14] : memref<96xi32, #tpu.memory_space<smem>>
    %16 = arith.index_cast %15 : i32 to index
    %c0_4 = arith.constant 0 : index
    %17 = vector.load %arg2[%16, %c0_4] : memref<22x32xf32, #tpu.memory_space<vmem>>, vector<1x32xf32>
    %c2 = arith.constant 2 : index
    %c0_5 = arith.constant 0 : index
    %18 = vector.load %arg3[%c2, %c0_5] : memref<32x32xf32, #tpu.memory_space<vmem>>, vector<1x32xf32>
    tpu.vector_store %arg3[%c2, %c0_5], %17 {strides = array<i32>} : memref<32x32xf32, #tpu.memory_space<vmem>>, vector<1x32xf32>,
    %c3_i32 = arith.constant 3 : i32
    %19 = arith.addi %0, %c3_i32 : i32
    %20 = arith.index_cast %19 : i32 to index
    %21 = memref.load %arg1[%20] : memref<96xi32, #tpu.memory_space<smem>>
    %22 = arith.index_cast %21 : i32 to index
    %c0_6 = arith.constant 0 : index
    %23 = vector.load %arg2[%22, %c0_6] : memref<22x32xf32, #tpu.memory_space<vmem>>, vector<1x32xf32>
    %c3 = arith.constant 3 : index
    %c0_7 = arith.constant 0 : index
    %24 = vector.load %arg3[%c3, %c0_7] : memref<32x32xf32, #tpu.memory_space<vmem>>, vector<1x32xf32>
    tpu.vector_store %arg3[%c3, %c0_7], %23 {strides = array<i32>} : memref<32x32xf32, #tpu.memory_space<vmem>>, vector<1x32xf32>,
    %c4_i32 = arith.constant 4 : i32
    %25 = arith.addi %0, %c4_i32 : i32
    %26 = arith.index_cast %25 : i32 to index
    %27 = memref.load %arg1[%26] : memref<96xi32, #tpu.memory_space<smem>>
    %28 = arith.index_cast %27 : i32 to index
    %c0_8 = arith.constant 0 : index
    %29 = vector.load %arg2[%28, %c0_8] : memref<22x32xf32, #tpu.memory_space<vmem>>, vector<1x32xf32>
    %c4 = arith.constant 4 : index
    %c0_9 = arith.constant 0 : index
    %30 = vector.load %arg3[%c4, %c0_9] : memref<32x32xf32, #tpu.memory_space<vmem>>, vector<1x32xf32>
    tpu.vector_store %arg3[%c4, %c0_9], %29 {strides = array<i32>} : memref<32x32xf32, #tpu.memory_space<vmem>>, vector<1x32xf32>,
    %c5_i32 = arith.constant 5 : i32
    %31 = arith.addi %0, %c5_i32 : i32
    %32 = arith.index_cast %31 : i32 to index
    %33 = memref.load %arg1[%32] : memref<96xi32, #tpu.memory_space<smem>>
    %34 = arith.index_cast %33 : i32 to index
    %c0_10 = arith.constant 0 : index
    %35 = vector.load %arg2[%34, %c0_10] : memref<22x32xf32, #tpu.memory_space<vmem>>, vector<1x32xf32>
    %c5 = arith.constant 5 : index
    %c0_11 = arith.constant 0 : index
    %36 = vector.load %arg3[%c5, %c0_11] : memref<32x32xf32, #tpu.memory_space<vmem>>, vector<1x32xf32>
    tpu.vector_store %arg3[%c5, %c0_11], %35 {strides = array<i32>} : memref<32x32xf32, #tpu.memory_space<vmem>>, vector<1x32xf32>,
    %c6_i32 = arith.constant 6 : i32
    %37 = arith.addi %0, %c6_i32 : i32
    %38 = arith.index_cast %37 : i32 to index
    %39 = memref.load %arg1[%38] : memref<96xi32, #tpu.memory_space<smem>>
    %40 = arith.index_cast %39 : i32 to index
    %c0_12 = arith.constant 0 : index
    %41 = vector.load %arg2[%40, %c0_12] : memref<22x32xf32, #tpu.memory_space<vmem>>, vector<1x32xf32>
    %c6 = arith.constant 6 : index
    %c0_13 = arith.constant 0 : index
    %42 = vector.load %arg3[%c6, %c0_13] : memref<32x32xf32, #tpu.memory_space<vmem>>, vector<1x32xf32>
    tpu.vector_store %arg3[%c6, %c0_13], %41 {strides = array<i32>} : memref<32x32xf32, #tpu.memory_space<vmem>>, vector<1x32xf32>,
    %c7_i32 = arith.constant 7 : i32
    %43 = arith.addi %0, %c7_i32 : i32
    %44 = arith.index_cast %43 : i32 to index
    %45 = memref.load %arg1[%44] : memref<96xi32, #tpu.memory_space<smem>>
    %46 = arith.index_cast %45 : i32 to index
    %c0_14 = arith.constant 0 : index
    %47 = vector.load %arg2[%46, %c0_14] : memref<22x32xf32, #tpu.memory_space<vmem>>, vector<1x32xf32>
    %c7 = arith.constant 7 : index
    %c0_15 = arith.constant 0 : index
    %48 = vector.load %arg3[%c7, %c0_15] : memref<32x32xf32, #tpu.memory_space<vmem>>, vector<1x32xf32>
    tpu.vector_store %arg3[%c7, %c0_15], %47 {strides = array<i32>} : memref<32x32xf32, #tpu.memory_space<vmem>>, vector<1x32xf32>,
    %c8_i32 = arith.constant 8 : i32
    %49 = arith.addi %0, %c8_i32 : i32
    %50 = arith.index_cast %49 : i32 to index
    %51 = memref.load %arg1[%50] : memref<96xi32, #tpu.memory_space<smem>>
    %52 = arith.index_cast %51 : i32 to index
    %c0_16 = arith.constant 0 : index
    %53 = vector.load %arg2[%52, %c0_16] : memref<22x32xf32, #tpu.memory_space<vmem>>, vector<1x32xf32>
    %c8 = arith.constant 8 : index
    %c0_17 = arith.constant 0 : index
    %54 = vector.load %arg3[%c8, %c0_17] : memref<32x32xf32, #tpu.memory_space<vmem>>, vector<1x32xf32>
    tpu.vector_store %arg3[%c8, %c0_17], %53 {strides = array<i32>} : memref<32x32xf32, #tpu.memory_space<vmem>>, vector<1x32xf32>,
    %c9_i32 = arith.constant 9 : i32
    %55 = arith.addi %0, %c9_i32 : i32
    %56 = arith.index_cast %55 : i32 to index
    %57 = memref.load %arg1[%56] : memref<96xi32, #tpu.memory_space<smem>>
    %58 = arith.index_cast %57 : i32 to index
    %c0_18 = arith.constant 0 : index
    %59 = vector.load %arg2[%58, %c0_18] : memref<22x32xf32, #tpu.memory_space<vmem>>, vector<1x32xf32>
    %c9 = arith.constant 9 : index
    %c0_19 = arith.constant 0 : index
    %60 = vector.load %arg3[%c9, %c0_19] : memref<32x32xf32, #tpu.memory_space<vmem>>, vector<1x32xf32>
    tpu.vector_store %arg3[%c9, %c0_19], %59 {strides = array<i32>} : memref<32x32xf32, #tpu.memory_space<vmem>>, vector<1x32xf32>,
    %c10_i32 = arith.constant 10 : i32
    %61 = arith.addi %0, %c10_i32 : i32
    %62 = arith.index_cast %61 : i32 to index
    %63 = memref.load %arg1[%62] : memref<96xi32, #tpu.memory_space<smem>>
    %64 = arith.index_cast %63 : i32 to index
    %c0_20 = arith.constant 0 : index
    %65 = vector.load %arg2[%64, %c0_20] : memref<22x32xf32, #tpu.memory_space<vmem>>, vector<1x32xf32>
    %c10 = arith.constant 10 : index
    %c0_21 = arith.constant 0 : index
    %66 = vector.load %arg3[%c10, %c0_21] : memref<32x32xf32, #tpu.memory_space<vmem>>, vector<1x32xf32>
    tpu.vector_store %arg3[%c10, %c0_21], %65 {strides = array<i32>} : memref<32x32xf32, #tpu.memory_space<vmem>>, vector<1x32xf32>,
    %c11_i32 = arith.constant 11 : i32
    %67 = arith.addi %0, %c11_i32 : i32
    %68 = arith.index_cast %67 : i32 to index
    %69 = memref.load %arg1[%68] : memref<96xi32, #tpu.memory_space<smem>>
    %70 = arith.index_cast %69 : i32 to index
    %c0_22 = arith.constant 0 : index
    %71 = vector.load %arg2[%70, %c0_22] : memref<22x32xf32, #tpu.memory_space<vmem>>, vector<1x32xf32>
    %c11 = arith.constant 11 : index
    %c0_23 = arith.constant 0 : index
    %72 = vector.load %arg3[%c11, %c0_23] : memref<32x32xf32, #tpu.memory_space<vmem>>, vector<1x32xf32>
    tpu.vector_store %arg3[%c11, %c0_23], %71 {strides = array<i32>} : memref<32x32xf32, #tpu.memory_space<vmem>>, vector<1x32xf32>,
    %c12_i32 = arith.constant 12 : i32
    %73 = arith.addi %0, %c12_i32 : i32
    %74 = arith.index_cast %73 : i32 to index
    %75 = memref.load %arg1[%74] : memref<96xi32, #tpu.memory_space<smem>>
    %76 = arith.index_cast %75 : i32 to index
    %c0_24 = arith.constant 0 : index
    %77 = vector.load %arg2[%76, %c0_24] : memref<22x32xf32, #tpu.memory_space<vmem>>, vector<1x32xf32>
    %c12 = arith.constant 12 : index
    %c0_25 = arith.constant 0 : index
    %78 = vector.load %arg3[%c12, %c0_25] : memref<32x32xf32, #tpu.memory_space<vmem>>, vector<1x32xf32>
    tpu.vector_store %arg3[%c12, %c0_25], %77 {strides = array<i32>} : memref<32x32xf32, #tpu.memory_space<vmem>>, vector<1x32xf32>,
    %c13_i32 = arith.constant 13 : i32
    %79 = arith.addi %0, %c13_i32 : i32
    %80 = arith.index_cast %79 : i32 to index
    %81 = memref.load %arg1[%80] : memref<96xi32, #tpu.memory_space<smem>>
    %82 = arith.index_cast %81 : i32 to index
    %c0_26 = arith.constant 0 : index
    %83 = vector.load %arg2[%82, %c0_26] : memref<22x32xf32, #tpu.memory_space<vmem>>, vector<1x32xf32>
    %c13 = arith.constant 13 : index
    %c0_27 = arith.constant 0 : index
    %84 = vector.load %arg3[%c13, %c0_27] : memref<32x32xf32, #tpu.memory_space<vmem>>, vector<1x32xf32>
    tpu.vector_store %arg3[%c13, %c0_27], %83 {strides = array<i32>} : memref<32x32xf32, #tpu.memory_space<vmem>>, vector<1x32xf32>,
    %c14_i32 = arith.constant 14 : i32
    %85 = arith.addi %0, %c14_i32 : i32
    %86 = arith.index_cast %85 : i32 to index
    %87 = memref.load %arg1[%86] : memref<96xi32, #tpu.memory_space<smem>>
    %88 = arith.index_cast %87 : i32 to index
    %c0_28 = arith.constant 0 : index
    %89 = vector.load %arg2[%88, %c0_28] : memref<22x32xf32, #tpu.memory_space<vmem>>, vector<1x32xf32>
    %c14 = arith.constant 14 : index
    %c0_29 = arith.constant 0 : index
    %90 = vector.load %arg3[%c14, %c0_29] : memref<32x32xf32, #tpu.memory_space<vmem>>, vector<1x32xf32>
    tpu.vector_store %arg3[%c14, %c0_29], %89 {strides = array<i32>} : memref<32x32xf32, #tpu.memory_space<vmem>>, vector<1x32xf32>,
    %c15_i32 = arith.constant 15 : i32
    %91 = arith.addi %0, %c15_i32 : i32
    %92 = arith.index_cast %91 : i32 to index
    %93 = memref.load %arg1[%92] : memref<96xi32, #tpu.memory_space<smem>>
    %94 = arith.index_cast %93 : i32 to index
    %c0_30 = arith.constant 0 : index
    %95 = vector.load %arg2[%94, %c0_30] : memref<22x32xf32, #tpu.memory_space<vmem>>, vector<1x32xf32>
    %c15 = arith.constant 15 : index
    %c0_31 = arith.constant 0 : index
    %96 = vector.load %arg3[%c15, %c0_31] : memref<32x32xf32, #tpu.memory_space<vmem>>, vector<1x32xf32>
    tpu.vector_store %arg3[%c15, %c0_31], %95 {strides = array<i32>} : memref<32x32xf32, #tpu.memory_space<vmem>>, vector<1x32xf32>,
    %c16_i32 = arith.constant 16 : i32
    %97 = arith.addi %0, %c16_i32 : i32
    %98 = arith.index_cast %97 : i32 to index
    %99 = memref.load %arg1[%98] : memref<96xi32, #tpu.memory_space<smem>>
    %100 = arith.index_cast %99 : i32 to index
    %c0_32 = arith.constant 0 : index
    %101 = vector.load %arg2[%100, %c0_32] : memref<22x32xf32, #tpu.memory_space<vmem>>, vector<1x32xf32>
    %c16 = arith.constant 16 : index
    %c0_33 = arith.constant 0 : index
    %102 = vector.load %arg3[%c16, %c0_33] : memref<32x32xf32, #tpu.memory_space<vmem>>, vector<1x32xf32>
    tpu.vector_store %arg3[%c16, %c0_33], %101 {strides = array<i32>} : memref<32x32xf32, #tpu.memory_space<vmem>>, vector<1x32xf32>,
    %c17_i32 = arith.constant 17 : i32
    %103 = arith.addi %0, %c17_i32 : i32
    %104 = arith.index_cast %103 : i32 to index
    %105 = memref.load %arg1[%104] : memref<96xi32, #tpu.memory_space<smem>>
    %106 = arith.index_cast %105 : i32 to index
    %c0_34 = arith.constant 0 : index
    %107 = vector.load %arg2[%106, %c0_34] : memref<22x32xf32, #tpu.memory_space<vmem>>, vector<1x32xf32>
    %c17 = arith.constant 17 : index
    %c0_35 = arith.constant 0 : index
    %108 = vector.load %arg3[%c17, %c0_35] : memref<32x32xf32, #tpu.memory_space<vmem>>, vector<1x32xf32>
    tpu.vector_store %arg3[%c17, %c0_35], %107 {strides = array<i32>} : memref<32x32xf32, #tpu.memory_space<vmem>>, vector<1x32xf32>,
    %c18_i32 = arith.constant 18 : i32
    %109 = arith.addi %0, %c18_i32 : i32
    %110 = arith.index_cast %109 : i32 to index
    %111 = memref.load %arg1[%110] : memref<96xi32, #tpu.memory_space<smem>>
    %112 = arith.index_cast %111 : i32 to index
    %c0_36 = arith.constant 0 : index
    %113 = vector.load %arg2[%112, %c0_36] : memref<22x32xf32, #tpu.memory_space<vmem>>, vector<1x32xf32>
    %c18 = arith.constant 18 : index
    %c0_37 = arith.constant 0 : index
    %114 = vector.load %arg3[%c18, %c0_37] : memref<32x32xf32, #tpu.memory_space<vmem>>, vector<1x32xf32>
    tpu.vector_store %arg3[%c18, %c0_37], %113 {strides = array<i32>} : memref<32x32xf32, #tpu.memory_space<vmem>>, vector<1x32xf32>,
    %c19_i32 = arith.constant 19 : i32
    %115 = arith.addi %0, %c19_i32 : i32
    %116 = arith.index_cast %115 : i32 to index
    %117 = memref.load %arg1[%116] : memref<96xi32, #tpu.memory_space<smem>>
    %118 = arith.index_cast %117 : i32 to index
    %c0_38 = arith.constant 0 : index
    %119 = vector.load %arg2[%118, %c0_38] : memref<22x32xf32, #tpu.memory_space<vmem>>, vector<1x32xf32>
    %c19 = arith.constant 19 : index
    %c0_39 = arith.constant 0 : index
    %120 = vector.load %arg3[%c19, %c0_39] : memref<32x32xf32, #tpu.memory_space<vmem>>, vector<1x32xf32>
    tpu.vector_store %arg3[%c19, %c0_39], %119 {strides = array<i32>} : memref<32x32xf32, #tpu.memory_space<vmem>>, vector<1x32xf32>,
    %c20_i32 = arith.constant 20 : i32
    %121 = arith.addi %0, %c20_i32 : i32
    %122 = arith.index_cast %121 : i32 to index
    %123 = memref.load %arg1[%122] : memref<96xi32, #tpu.memory_space<smem>>
    %124 = arith.index_cast %123 : i32 to index
    %c0_40 = arith.constant 0 : index
    %125 = vector.load %arg2[%124, %c0_40] : memref<22x32xf32, #tpu.memory_space<vmem>>, vector<1x32xf32>
    %c20 = arith.constant 20 : index
    %c0_41 = arith.constant 0 : index
    %126 = vector.load %arg3[%c20, %c0_41] : memref<32x32xf32, #tpu.memory_space<vmem>>, vector<1x32xf32>
    tpu.vector_store %arg3[%c20, %c0_41], %125 {strides = array<i32>} : memref<32x32xf32, #tpu.memory_space<vmem>>, vector<1x32xf32>,
    %c21_i32 = arith.constant 21 : i32
    %127 = arith.addi %0, %c21_i32 : i32
    %128 = arith.index_cast %127 : i32 to index
    %129 = memref.load %arg1[%128] : memref<96xi32, #tpu.memory_space<smem>>
    %130 = arith.index_cast %129 : i32 to index
    %c0_42 = arith.constant 0 : index
    %131 = vector.load %arg2[%130, %c0_42] : memref<22x32xf32, #tpu.memory_space<vmem>>, vector<1x32xf32>
    %c21 = arith.constant 21 : index
    %c0_43 = arith.constant 0 : index
    %132 = vector.load %arg3[%c21, %c0_43] : memref<32x32xf32, #tpu.memory_space<vmem>>, vector<1x32xf32>
    tpu.vector_store %arg3[%c21, %c0_43], %131 {strides = array<i32>} : memref<32x32xf32, #tpu.memory_space<vmem>>, vector<1x32xf32>,
    %c22_i32 = arith.constant 22 : i32
    %133 = arith.addi %0, %c22_i32 : i32
    %134 = arith.index_cast %133 : i32 to index
    %135 = memref.load %arg1[%134] : memref<96xi32, #tpu.memory_space<smem>>
    %136 = arith.index_cast %135 : i32 to index
    %c0_44 = arith.constant 0 : index
    %137 = vector.load %arg2[%136, %c0_44] : memref<22x32xf32, #tpu.memory_space<vmem>>, vector<1x32xf32>
    %c22 = arith.constant 22 : index
    %c0_45 = arith.constant 0 : index
    %138 = vector.load %arg3[%c22, %c0_45] : memref<32x32xf32, #tpu.memory_space<vmem>>, vector<1x32xf32>
    tpu.vector_store %arg3[%c22, %c0_45], %137 {strides = array<i32>} : memref<32x32xf32, #tpu.memory_space<vmem>>, vector<1x32xf32>,
    %c23_i32 = arith.constant 23 : i32
    %139 = arith.addi %0, %c23_i32 : i32
    %140 = arith.index_cast %139 : i32 to index
    %141 = memref.load %arg1[%140] : memref<96xi32, #tpu.memory_space<smem>>
    %142 = arith.index_cast %141 : i32 to index
    %c0_46 = arith.constant 0 : index
    %143 = vector.load %arg2[%142, %c0_46] : memref<22x32xf32, #tpu.memory_space<vmem>>, vector<1x32xf32>
    %c23 = arith.constant 23 : index
    %c0_47 = arith.constant 0 : index
    %144 = vector.load %arg3[%c23, %c0_47] : memref<32x32xf32, #tpu.memory_space<vmem>>, vector<1x32xf32>
    tpu.vector_store %arg3[%c23, %c0_47], %143 {strides = array<i32>} : memref<32x32xf32, #tpu.memory_space<vmem>>, vector<1x32xf32>,
    %c24_i32 = arith.constant 24 : i32
    %145 = arith.addi %0, %c24_i32 : i32
    %146 = arith.index_cast %145 : i32 to index
    %147 = memref.load %arg1[%146] : memref<96xi32, #tpu.memory_space<smem>>
    %148 = arith.index_cast %147 : i32 to index
    %c0_48 = arith.constant 0 : index
    %149 = vector.load %arg2[%148, %c0_48] : memref<22x32xf32, #tpu.memory_space<vmem>>, vector<1x32xf32>
    %c24 = arith.constant 24 : index
    %c0_49 = arith.constant 0 : index
    %150 = vector.load %arg3[%c24, %c0_49] : memref<32x32xf32, #tpu.memory_space<vmem>>, vector<1x32xf32>
    tpu.vector_store %arg3[%c24, %c0_49], %149 {strides = array<i32>} : memref<32x32xf32, #tpu.memory_space<vmem>>, vector<1x32xf32>,
    %c25_i32 = arith.constant 25 : i32
    %151 = arith.addi %0, %c25_i32 : i32
    %152 = arith.index_cast %151 : i32 to index
    %153 = memref.load %arg1[%152] : memref<96xi32, #tpu.memory_space<smem>>
    %154 = arith.index_cast %153 : i32 to index
    %c0_50 = arith.constant 0 : index
    %155 = vector.load %arg2[%154, %c0_50] : memref<22x32xf32, #tpu.memory_space<vmem>>, vector<1x32xf32>
    %c25 = arith.constant 25 : index
    %c0_51 = arith.constant 0 : index
    %156 = vector.load %arg3[%c25, %c0_51] : memref<32x32xf32, #tpu.memory_space<vmem>>, vector<1x32xf32>
    tpu.vector_store %arg3[%c25, %c0_51], %155 {strides = array<i32>} : memref<32x32xf32, #tpu.memory_space<vmem>>, vector<1x32xf32>,
    %c26_i32 = arith.constant 26 : i32
    %157 = arith.addi %0, %c26_i32 : i32
    %158 = arith.index_cast %157 : i32 to index
    %159 = memref.load %arg1[%158] : memref<96xi32, #tpu.memory_space<smem>>
    %160 = arith.index_cast %159 : i32 to index
    %c0_52 = arith.constant 0 : index
    %161 = vector.load %arg2[%160, %c0_52] : memref<22x32xf32, #tpu.memory_space<vmem>>, vector<1x32xf32>
    %c26 = arith.constant 26 : index
    %c0_53 = arith.constant 0 : index
    %162 = vector.load %arg3[%c26, %c0_53] : memref<32x32xf32, #tpu.memory_space<vmem>>, vector<1x32xf32>
    tpu.vector_store %arg3[%c26, %c0_53], %161 {strides = array<i32>} : memref<32x32xf32, #tpu.memory_space<vmem>>, vector<1x32xf32>,
    %c27_i32 = arith.constant 27 : i32
    %163 = arith.addi %0, %c27_i32 : i32
    %164 = arith.index_cast %163 : i32 to index
    %165 = memref.load %arg1[%164] : memref<96xi32, #tpu.memory_space<smem>>
    %166 = arith.index_cast %165 : i32 to index
    %c0_54 = arith.constant 0 : index
    %167 = vector.load %arg2[%166, %c0_54] : memref<22x32xf32, #tpu.memory_space<vmem>>, vector<1x32xf32>
    %c27 = arith.constant 27 : index
    %c0_55 = arith.constant 0 : index
    %168 = vector.load %arg3[%c27, %c0_55] : memref<32x32xf32, #tpu.memory_space<vmem>>, vector<1x32xf32>
    tpu.vector_store %arg3[%c27, %c0_55], %167 {strides = array<i32>} : memref<32x32xf32, #tpu.memory_space<vmem>>, vector<1x32xf32>,
    %c28_i32 = arith.constant 28 : i32
    %169 = arith.addi %0, %c28_i32 : i32
    %170 = arith.index_cast %169 : i32 to index
    %171 = memref.load %arg1[%170] : memref<96xi32, #tpu.memory_space<smem>>
    %172 = arith.index_cast %171 : i32 to index
    %c0_56 = arith.constant 0 : index
    %173 = vector.load %arg2[%172, %c0_56] : memref<22x32xf32, #tpu.memory_space<vmem>>, vector<1x32xf32>
    %c28 = arith.constant 28 : index
    %c0_57 = arith.constant 0 : index
    %174 = vector.load %arg3[%c28, %c0_57] : memref<32x32xf32, #tpu.memory_space<vmem>>, vector<1x32xf32>
    tpu.vector_store %arg3[%c28, %c0_57], %173 {strides = array<i32>} : memref<32x32xf32, #tpu.memory_space<vmem>>, vector<1x32xf32>,
    %c29_i32 = arith.constant 29 : i32
    %175 = arith.addi %0, %c29_i32 : i32
    %176 = arith.index_cast %175 : i32 to index
    %177 = memref.load %arg1[%176] : memref<96xi32, #tpu.memory_space<smem>>
    %178 = arith.index_cast %177 : i32 to index
    %c0_58 = arith.constant 0 : index
    %179 = vector.load %arg2[%178, %c0_58] : memref<22x32xf32, #tpu.memory_space<vmem>>, vector<1x32xf32>
    %c29 = arith.constant 29 : index
    %c0_59 = arith.constant 0 : index
    %180 = vector.load %arg3[%c29, %c0_59] : memref<32x32xf32, #tpu.memory_space<vmem>>, vector<1x32xf32>
    tpu.vector_store %arg3[%c29, %c0_59], %179 {strides = array<i32>} : memref<32x32xf32, #tpu.memory_space<vmem>>, vector<1x32xf32>,
    %c30_i32 = arith.constant 30 : i32
    %181 = arith.addi %0, %c30_i32 : i32
    %182 = arith.index_cast %181 : i32 to index
    %183 = memref.load %arg1[%182] : memref<96xi32, #tpu.memory_space<smem>>
    %184 = arith.index_cast %183 : i32 to index
    %c0_60 = arith.constant 0 : index
    %185 = vector.load %arg2[%184, %c0_60] : memref<22x32xf32, #tpu.memory_space<vmem>>, vector<1x32xf32>
    %c30 = arith.constant 30 : index
    %c0_61 = arith.constant 0 : index
    %186 = vector.load %arg3[%c30, %c0_61] : memref<32x32xf32, #tpu.memory_space<vmem>>, vector<1x32xf32>
    tpu.vector_store %arg3[%c30, %c0_61], %185 {strides = array<i32>} : memref<32x32xf32, #tpu.memory_space<vmem>>, vector<1x32xf32>,
    %c31_i32 = arith.constant 31 : i32
    %187 = arith.addi %0, %c31_i32 : i32
    %188 = arith.index_cast %187 : i32 to index
    %189 = memref.load %arg1[%188] : memref<96xi32, #tpu.memory_space<smem>>
    %190 = arith.index_cast %189 : i32 to index
    %c0_62 = arith.constant 0 : index
    %191 = vector.load %arg2[%190, %c0_62] : memref<22x32xf32, #tpu.memory_space<vmem>>, vector<1x32xf32>
    %c31 = arith.constant 31 : index
    %c0_63 = arith.constant 0 : index
    %192 = vector.load %arg3[%c31, %c0_63] : memref<32x32xf32, #tpu.memory_space<vmem>>, vector<1x32xf32>
    tpu.vector_store %arg3[%c31, %c0_63], %191 {strides = array<i32>} : memref<32x32xf32, #tpu.memory_space<vmem>>, vector<1x32xf32>,
    return
  }
  func.func @transform_0(%arg0: i32, %arg1: memref<96xi32, #tpu.memory_space<smem>>) -> (i32, i32) {
    %c0_i32 = arith.constant 0 : i32
    %c0_i32_0 = arith.constant 0 : i32
    %c0_i32_1 = arith.constant 0 : i32
    return %c0_i32, %c0_i32_0 : i32, i32
  }
  func.func @transform_1(%arg0: i32, %arg1: memref<96xi32, #tpu.memory_space<smem>>) -> (i32, i32) {
    %c0_i32 = arith.constant 0 : i32
    %c0_i32_0 = arith.constant 0 : i32
    return %arg0, %c0_i32 : i32, i32
  }
}

</mosaic_0001>

<bundles_post_ra>
// kernel: tpu_custom_call.1
= control target key start
LH: loop header
LB: loop body
LE: loop exit
PB: predicated region body
PF: predicated region fallthrough
CT: control target
= control target key end

     0   :  { %s448_s9 = smov [#allocation3]   ;;  %s606_s0 = inlined_call_operand.hbm [shape: s32[96], index: 0, kind: input, shape index: {}]   ;;  %s607_s1 = inlined_call_operand.hbm [shape: f32[22,32], index: 1, kind: input, shape index: {}]   ;;  %s608_s2 = inlined_call_operand.vmem [shape: f32[96,32], index: 2, kind: output, shape index: {}]  }
   0x1   :  { %8 = dma.hbm_to_smem %s606_s0, 16, %s448_s9, [#allocation2] }
   0x2   :  { %438 = dma.done.wait [#allocation2], 16 }
   0x3   :  { %439 = vsyncadd [#allocation2], 4294967280 }
   0x4   :  { %10 = sfence }
   0x5   :  { %11 = vsyncpa [#allocation5], 0  ;;  %s470_s12 = smov 0  }
   0x6 LB: > { %s476_s13 = sadd.s32 4294967295, %s446_s12   ;;  %p369_p0 = scmp.ge.s32.totalorder %s446_s12, 1  ;;  %s446_s12 = sphi %s470_s12, %s17_s12  }
   0x7   : > { %p69_p1 = scmp.lt.s32.totalorder %s446_s12, 4  ;;  %s449_s0 = smov [#allocation4]  }
   0x8   : > { %s81_s14 = sshll.u32 %s449_s0, 4  ;;  %p386_p3 = scmp.eq.s32.totalorder %s476_s13, 0  ;;  %s82_s14 = int_to_ptr.vmem [resolvable:$true] %s81_s14 }
   0x9   : > { %p480_p2 = pnand %p369_p0, %p69_p1  ;;  %s419_s16 = scalar_lea.vmem %s82_s14, 384 }
   0xa   : > { %p420_p7 = scmp.ne.s32.totalorder %s82_s14, %s419_s16  ;;  %p427_p10 = scmp.lt.s32.totalorder %s82_s14, %s82_s14 }
   0xb   : > { %p382_p4 = pneg %p480_p2  ;;  %p428_p11 = scmp.lt.s32.totalorder %s419_s16, %s419_s16 }
   0xd   : > { %p383_p5 = pnand %p386_p3, %p382_p4  ;;  %p429_p12 = por %p428_p11, %p427_p10 }
   0xf   : > { %p410_p6 = pneg %p383_p5 }
  0x11   : > { %p422_p8 = pnand %p420_p7, %p410_p6 }
  0x13   : > { %p423_p9 = pneg %p422_p8 }
  0x15   : > { %p430_p13 = pnand %p429_p12, %p423_p9 }
  0x17   : > { %433 = shalt.err (!%p430_p13)
}
  0x18   : > { %s450_s17 = smov 128   ;;  %s451_s18 = smov 8  }
  0x19   : > { %385 = dma.hbm_to_vmem [thread:$0]  (!%p383_p5), %s607_s1, 384, %s82_s14, [#allocation5], %s450_s17, %s450_s17, %s451_s18  }
  0x1a   : > { %97 = sbr.rel (%p480_p2) target bundleno = 88 (0x58), region = 24 }
  0x1f   : > { %441 = dma.done.wait (%p386_p3), [#allocation5], 384  }
  0x20   : > { %443 = vsyncadd (%p386_p3), [#allocation5], 4294966912  ;;  %s373_s21 = sshll.u32 %s476_s13, 2  ;;  %s500_s22 = sshll.u32 %s476_s13, 5  ;;  %vm122_vm0 = vcmask 253952  }
  0x21   : > { %p113_p0 = scmp.lt.s32.totalorder %s373_s21, 11  ;;  %s119_s23 = sld [smem:[#allocation3 + %s500_s22]] }
  0x22   : > { %s124_s24 = sadd.s32 1, %s500_s22  ;;  %s129_s25 = sadd.s32 2, %s500_s22 }
  0x23   : > { %s611_s21 = smov (!%p113_p0, %s373_s21), 11  ;;  %s125_s26 = sld [smem:[#allocation3 + %s124_s24]] }
  0x24   : > { %s134_s27 = sadd.s32 3, %s500_s22  ;;  %s374_s28 = sshll.u32 %s611_s21, 3 }
  0x25   : > { %s130_s29 = sld [smem:[#allocation3 + %s129_s25]]  ;;  %s509_s4 = scalar_lea.vmem %s608_s2, %s374_s28 }
  0x26   : > { %s135_s5 = sld [smem:[#allocation3 + %s134_s27]]  ;;  %s139_s6 = sadd.s32 4, %s500_s22 }
  0x27   : > { %s120_s7 = scalar_lea.vmem [#allocation4], %s119_s23  ;;  %s140_s8 = sld [smem:[#allocation3 + %s139_s6]] }
  0x28   : > { %v121_v0 = vld [vmem:[%s120_s7] sm:$0x1]  ;;  %s144_s9 = sadd.s32 5, %s500_s22  ;;  %s149_s11 = sadd.s32 6, %s500_s22 }
  0x29   : > { %123 = vst.msk [vmem:[%s509_s4] sm:$0x1] %vm122_vm0, %v121_v0  ;;  %s145_s10 = sld [smem:[#allocation3 + %s144_s9]]  ;;  %s126_s0 = scalar_lea.vmem [#allocation4], %s125_s26 }
  0x2a   : > { %s150_s13 = sld [smem:[#allocation3 + %s149_s11]]  ;;  %v127_v1 = vld [vmem:[%s126_s0] sm:$0x1]  ;;  %s154_s14 = sadd.s32 7, %s500_s22 }
  0x2b   : > { %128 = vst.msk [vmem:[%s509_s4 + $0x1] sm:$0x1] %vm122_vm0, %v127_v1  ;;  %s131_s15 = scalar_lea.vmem [#allocation4], %s130_s29  ;;  %s155_s16 = sld [smem:[#allocation3 + %s154_s14]] }
  0x2c   : > { %v132_v2 = vld [vmem:[%s131_s15] sm:$0x1]  ;;  %s136_s17 = scalar_lea.vmem [#allocation4], %s135_s5  ;;  %s159_s18 = sadd.s32 8, %s500_s22 }
  0x2d   : > { %133 = vst.msk [vmem:[%s509_s4 + $0x2] sm:$0x1] %vm122_vm0, %v132_v2  ;;  %v137_v3 = vld [vmem:[%s136_s17] sm:$0x1]  ;;  %s164_s19 = sadd.s32 9, %s500_s22  ;;  %s160_s20 = sld [smem:[#allocation3 + %s159_s18]] }
  0x2e   : > { %138 = vst.msk [vmem:[%s509_s4 + $0x3] sm:$0x1] %vm122_vm0, %v137_v3  ;;  %s141_s21 = scalar_lea.vmem [#allocation4], %s140_s8  ;;  %s165_s23 = sld [smem:[#allocation3 + %s164_s19]] }
  0x2f   : > { %v142_v4 = vld [vmem:[%s141_s21] sm:$0x1]  ;;  %s146_s24 = scalar_lea.vmem [#allocation4], %s145_s10  ;;  %s169_s25 = sadd.s32 10, %s500_s22 }
  0x30   : > { %143 = vst.msk [vmem:[%s509_s4 + $0x4] sm:$0x1] %vm122_vm0, %v142_v4  ;;  %v147_v5 = vld [vmem:[%s146_s24] sm:$0x1]  ;;  %s151_s26 = scalar_lea.vmem [#allocation4], %s150_s13  ;;  %s170_s27 = sld [smem:[#allocation3 + %s169_s25]] }
  0x31   : > { %148 = vst.msk [vmem:[%s509_s4 + $0x5] sm:$0x1] %vm122_vm0, %v147_v5  ;;  %v152_v6 = vld [vmem:[%s151_s26] sm:$0x1]  ;;  %s174_s28 = sadd.s32 11, %s500_s22  ;;  %s156_s30 = scalar_lea.vmem [#allocation4], %s155_s16 }
  0x32   : > { %153 = vst.msk [vmem:[%s509_s4 + $0x6] sm:$0x1] %vm122_vm0, %v152_v6  ;;  %s175_s29 = sld [smem:[#allocation3 + %s174_s28]]  ;;  %v157_v7 = vld [vmem:[%s156_s30] sm:$0x1]  ;;  %s179_s3 = sadd.s32 12, %s500_s22 }
  0x33   : > { %s184_s5 = sadd.s32 13, %s500_s22  ;;  %158 = vst.msk [vmem:[%s509_s4 + $0x7] sm:$0x1] %vm122_vm0, %v157_v7  ;;  %s180_s6 = sld [smem:[#allocation3 + %s179_s3]] }
  0x34   : > { %s161_s7 = scalar_lea.vmem [#allocation4], %s160_s20  ;;  %s185_s8 = sld [smem:[#allocation3 + %s184_s5]] }
  0x35   : > { %v162_v8 = vld [vmem:[%s161_s7] sm:$0x1]  ;;  %s166_s9 = scalar_lea.vmem [#allocation4], %s165_s23  ;;  %s189_s10 = sadd.s32 14, %s500_s22 }
  0x36   : > { %163 = vst.msk [vmem:[%s509_s4 + $0x8] sm:$0x1] %vm122_vm0, %v162_v8  ;;  %v167_v9 = vld [vmem:[%s166_s9] sm:$0x1]  ;;  %s194_s11 = sadd.s32 15, %s500_s22  ;;  %s190_s13 = sld [smem:[#allocation3 + %s189_s10]] }
  0x37   : > { %168 = vst.msk [vmem:[%s509_s4 + $0x9] sm:$0x1] %vm122_vm0, %v167_v9  ;;  %s171_s0 = scalar_lea.vmem [#allocation4], %s170_s27  ;;  %s195_s14 = sld [smem:[#allocation3 + %s194_s11]] }
  0x38   : > { %v172_v10 = vld [vmem:[%s171_s0] sm:$0x1]  ;;  %s176_s15 = scalar_lea.vmem [#allocation4], %s175_s29  ;;  %s199_s16 = sadd.s32 16, %s500_s22 }
  0x39   : > { %173 = vst.msk [vmem:[%s509_s4 + $0xa] sm:$0x1] %vm122_vm0, %v172_v10  ;;  %v177_v11 = vld [vmem:[%s176_s15] sm:$0x1]  ;;  %s204_s17 = sadd.s32 17, %s500_s22  ;;  %s200_s18 = sld [smem:[#allocation3 + %s199_s16]] }
  0x3a   : > { %178 = vst.msk [vmem:[%s509_s4 + $0xb] sm:$0x1] %vm122_vm0, %v177_v11  ;;  %s181_s19 = scalar_lea.vmem [#allocation4], %s180_s6  ;;  %s205_s20 = sld [smem:[#allocation3 + %s204_s17]] }
  0x3b   : > { %v182_v12 = vld [vmem:[%s181_s19] sm:$0x1]  ;;  %s186_s21 = scalar_lea.vmem [#allocation4], %s185_s8  ;;  %s209_s23 = sadd.s32 18, %s500_s22 }
  0x3c   : > { %183 = vst.msk [vmem:[%s509_s4 + $0xc] sm:$0x1] %vm122_vm0, %v182_v12  ;;  %v187_v13 = vld [vmem:[%s186_s21] sm:$0x1]  ;;  %s214_s24 = sadd.s32 19, %s500_s22  ;;  %s210_s25 = sld [smem:[#allocation3 + %s209_s23]] }
  0x3d   : > { %188 = vst.msk [vmem:[%s509_s4 + $0xd] sm:$0x1] %vm122_vm0, %v187_v13  ;;  %s191_s26 = scalar_lea.vmem [#allocation4], %s190_s13  ;;  %s215_s27 = sld [smem:[#allocation3 + %s214_s24]] }
  0x3e   : > { %v192_v14 = vld [vmem:[%s191_s26] sm:$0x1]  ;;  %s196_s28 = scalar_lea.vmem [#allocation4], %s195_s14  ;;  %s219_s29 = sadd.s32 20, %s500_s22 }
  0x3f   : > { %193 = vst.msk [vmem:[%s509_s4 + $0xe] sm:$0x1] %vm122_vm0, %v192_v14  ;;  %v197_v15 = vld [vmem:[%s196_s28] sm:$0x1]  ;;  %s224_s30 = sadd.s32 21, %s500_s22  ;;  %s220_s3 = sld [smem:[#allocation3 + %s219_s29]] }
  0x40   : > { %198 = vst.msk [vmem:[%s509_s4 + $0xf] sm:$0x1] %vm122_vm0, %v197_v15  ;;  %s201_s5 = scalar_lea.vmem [#allocation4], %s200_s18  ;;  %s225_s6 = sld [smem:[#allocation3 + %s224_s30]] }
  0x41   : > { %v202_v16 = vld [vmem:[%s201_s5] sm:$0x1]  ;;  %s206_s7 = scalar_lea.vmem [#allocation4], %s205_s20  ;;  %s229_s8 = sadd.s32 22, %s500_s22 }
  0x42   : > { %203 = vst.msk [vmem:[%s509_s4 + $0x10] sm:$0x1] %vm122_vm0, %v202_v16  ;;  %v207_v17 = vld [vmem:[%s206_s7] sm:$0x1]  ;;  %s234_s9 = sadd.s32 23, %s500_s22  ;;  %s230_s10 = sld [smem:[#allocation3 + %s229_s8]] }
  0x43   : > { %208 = vst.msk [vmem:[%s509_s4 + $0x11] sm:$0x1] %vm122_vm0, %v207_v17  ;;  %s211_s11 = scalar_lea.vmem [#allocation4], %s210_s25  ;;  %s235_s13 = sld [smem:[#allocation3 + %s234_s9]] }
  0x44   : > { %v212_v18 = vld [vmem:[%s211_s11] sm:$0x1]  ;;  %s216_s0 = scalar_lea.vmem [#allocation4], %s215_s27  ;;  %s239_s14 = sadd.s32 24, %s500_s22 }
  0x45   : > { %213 = vst.msk [vmem:[%s509_s4 + $0x12] sm:$0x1] %vm122_vm0, %v212_v18  ;;  %v217_v19 = vld [vmem:[%s216_s0] sm:$0x1]  ;;  %s244_s15 = sadd.s32 25, %s500_s22  ;;  %s240_s16 = sld [smem:[#allocation3 + %s239_s14]] }
  0x46   : > { %218 = vst.msk [vmem:[%s509_s4 + $0x13] sm:$0x1] %vm122_vm0, %v217_v19  ;;  %s221_s17 = scalar_lea.vmem [#allocation4], %s220_s3  ;;  %s245_s18 = sld [smem:[#allocation3 + %s244_s15]] }
  0x47   : > { %v222_v20 = vld [vmem:[%s221_s17] sm:$0x1]  ;;  %s226_s19 = scalar_lea.vmem [#allocation4], %s225_s6  ;;  %s249_s20 = sadd.s32 26, %s500_s22 }
  0x48   : > { %223 = vst.msk [vmem:[%s509_s4 + $0x14] sm:$0x1] %vm122_vm0, %v222_v20  ;;  %v227_v21 = vld [vmem:[%s226_s19] sm:$0x1]  ;;  %s254_s21 = sadd.s32 27, %s500_s22  ;;  %s250_s23 = sld [smem:[#allocation3 + %s249_s20]] }
  0x49   : > { %228 = vst.msk [vmem:[%s509_s4 + $0x15] sm:$0x1] %vm122_vm0, %v227_v21  ;;  %s231_s24 = scalar_lea.vmem [#allocation4], %s230_s10  ;;  %s255_s25 = sld [smem:[#allocation3 + %s254_s21]] }
  0x4a   : > { %v232_v22 = vld [vmem:[%s231_s24] sm:$0x1]  ;;  %s236_s26 = scalar_lea.vmem [#allocation4], %s235_s13  ;;  %s259_s27 = sadd.s32 28, %s500_s22 }
  0x4b   : > { %233 = vst.msk [vmem:[%s509_s4 + $0x16] sm:$0x1] %vm122_vm0, %v232_v22  ;;  %v237_v23 = vld [vmem:[%s236_s26] sm:$0x1]  ;;  %s264_s28 = sadd.s32 29, %s500_s22  ;;  %s260_s29 = sld [smem:[#allocation3 + %s259_s27]] }
  0x4c   : > { %238 = vst.msk [vmem:[%s509_s4 + $0x17] sm:$0x1] %vm122_vm0, %v237_v23  ;;  %s241_s30 = scalar_lea.vmem [#allocation4], %s240_s16  ;;  %s265_s3 = sld [smem:[#allocation3 + %s264_s28]] }
  0x4d   : > { %v242_v24 = vld [vmem:[%s241_s30] sm:$0x1]  ;;  %s246_s5 = scalar_lea.vmem [#allocation4], %s245_s18  ;;  %s269_s6 = sadd.s32 30, %s500_s22 }
  0x4e   : > { %243 = vst.msk [vmem:[%s509_s4 + $0x18] sm:$0x1] %vm122_vm0, %v242_v24  ;;  %v247_v25 = vld [vmem:[%s246_s5] sm:$0x1]  ;;  %s274_s7 = sadd.s32 31, %s500_s22  ;;  %s270_s8 = sld [smem:[#allocation3 + %s269_s6]] }
  0x4f   : > { %248 = vst.msk [vmem:[%s509_s4 + $0x19] sm:$0x1] %vm122_vm0, %v247_v25  ;;  %s251_s9 = scalar_lea.vmem [#allocation4], %s250_s23  ;;  %s275_s10 = sld [smem:[#allocation3 + %s274_s7]] }
  0x50   : > { %v252_v26 = vld [vmem:[%s251_s9] sm:$0x1]  ;;  %s256_s11 = scalar_lea.vmem [#allocation4], %s255_s25 }
  0x51   : > { %253 = vst.msk [vmem:[%s509_s4 + $0x1a] sm:$0x1] %vm122_vm0, %v252_v26  ;;  %v257_v27 = vld [vmem:[%s256_s11] sm:$0x1]  ;;  %s261_s13 = scalar_lea.vmem [#allocation4], %s260_s29 }
  0x52   : > { %258 = vst.msk [vmem:[%s509_s4 + $0x1b] sm:$0x1] %vm122_vm0, %v257_v27  ;;  %v262_v28 = vld [vmem:[%s261_s13] sm:$0x1]  ;;  %s266_s0 = scalar_lea.vmem [#allocation4], %s265_s3 }
  0x53   : > { %263 = vst.msk [vmem:[%s509_s4 + $0x1c] sm:$0x1] %vm122_vm0, %v262_v28  ;;  %v267_v29 = vld [vmem:[%s266_s0] sm:$0x1] }
  0x54   : > { %268 = vst.msk [vmem:[%s509_s4 + $0x1d] sm:$0x1] %vm122_vm0, %v267_v29  ;;  %s271_s22 = scalar_lea.vmem [#allocation4], %s270_s8 }
  0x55   : > { %v272_v30 = vld [vmem:[%s271_s22] sm:$0x1]  ;;  %s276_s14 = scalar_lea.vmem [#allocation4], %s275_s10 }
  0x56   : > { %273 = vst.msk [vmem:[%s509_s4 + $0x1e] sm:$0x1] %vm122_vm0, %v272_v30  ;;  %v277_v31 = vld [vmem:[%s276_s14] sm:$0x1] }
  0x57   : > { %278 = vst.msk [vmem:[%s509_s4 + $0x1f] sm:$0x1] %vm122_vm0, %v277_v31 }
  0x58 PF: > { %s17_s12 = sadd.s32 1, %s446_s12  }
  0x59   : > { %p14_p1 = scmp.ge.s32.totalorder %s17_s12, 5  }
  0x5b   :  { %16 = sbr.rel (!%p14_p1) target bundleno = 6 (0x6), region = 88 }
  0x60   :  { %301 = vsyncpa [#allocation5], 1 }
  0x61   :  { %303 = vsyncpa [#allocation5 + $0x1], 1 }

</bundles_post_ra>
